<compile_context>
chip_gen: v6e
topology: v6e:2x2x1
jax: 0.10.0
libtpu: 0.0.40
codegen_flags: <defaults>
</compile_context>

<pallas_src>
import functools

import jax
import jax.numpy as jnp
from jax.experimental import pallas as pl
from jax.experimental.pallas import tpu as pltpu


def _round_up(v, m):
    return (v + m - 1) // m * m


# ---------- Stage 1: build W = S · diag(attr) · G, accumulated over edge tiles --------
def _build_w_kernel(src_ref, dst_ref, attr_ref, w_ref, *, compute_dtype):
    # src_ref / dst_ref : VMEM int32   (1, E_TILE)   lane-dense edge index rows
    # attr_ref          : VMEM float32 (1, E_TILE)   (padded edges have attr = 0)
    # w_ref             : VMEM float32 (n_out_pad, n_in_pad)  accumulator across e-steps
    e_tile = src_ref.shape[1]
    n_out_pad, n_in_pad = w_ref.shape

    @pl.when(pl.program_id(0) == 0)
    def _():
        w_ref[...] = jnp.zeros_like(w_ref)

    # Scatter one-hot  S[o, e] = (dst[e] == o)                     (n_out_pad, E_TILE)
    out_ids = jax.lax.broadcasted_iota(jnp.int32, (n_out_pad, e_tile), 0)
    s = (out_ids == dst_ref[...]).astype(compute_dtype)

    # attr-folded gather one-hot (transposed):  Ga[j, e] = attr[e] * (src[e] == j)
    # Folding attr here removes the per-feature-tile (E, TF) elementwise multiply.
    in_ids = jax.lax.broadcasted_iota(jnp.int32, (n_in_pad, e_tile), 0)
    ga = jnp.where(in_ids == src_ref[...], attr_ref[...], 0.0).astype(compute_dtype)

    # W += S @ Ga^T : contract the shared edge (lane) axis of both operands on the MXU,
    # f32 accumulation regardless of compute_dtype.
    w_ref[...] += jax.lax.dot_general(
        s, ga,
        dimension_numbers=(((1,), (1,)), ((), ())),
        preferred_element_type=jnp.float32,
    )


# ---------- Stage 2: apply W to each feature tile --------------------------------------
def _apply_w_kernel(w_ref, x_ref, out_ref, *, compute_dtype):
    # w_ref  : VMEM float32 (n_out_pad, n_in_pad)   grid-invariant
    # x_ref  : VMEM float32 (n_in_pad, TF)
    # out_ref: VMEM float32 (n_out_pad, TF)         lane-dense store
    out_ref[...] = jnp.dot(
        w_ref[...].astype(compute_dtype),
        x_ref[...].astype(compute_dtype),
        preferred_element_type=jnp.float32,
    )


def custom_unpooling(x, edge_index, edge_attr, graphUnpoolData, *,
                     compute_dtype=jnp.float32):
    """JAX/Pallas equivalent of CustomUnpooling.forward.

    x:          (inputSize, F) float32
    edge_index: (2, E) int32   -- row 0 = source (index into x), row 1 = target
    edge_attr:  (E,) float32
    graphUnpoolData: dict with 'inputSize', 'outputSize'
    compute_dtype: jnp.float32 (exact) or jnp.bfloat16 (fast MXU path, f32 accumulate).
    """
    n_in = int(graphUnpoolData["inputSize"])
    n_out = int(graphUnpoolData["outputSize"])
    E = int(edge_index.shape[1])
    F = int(x.shape[1])
    assert x.shape[0] == n_in

    cd_bytes = jnp.dtype(compute_dtype).itemsize

    # Padded node counts (lane dim of W / x -> 128, sublane dim of W / out -> 8).
    n_in_pad = _round_up(max(n_in, 1), 128)
    n_out_pad = _round_up(max(n_out, 1), 8)
    w_bytes = n_out_pad * n_in_pad * 4

    # ----- Stage 1 tiling: pick the edge tile from a VMEM temp budget (v7x-safe). -----
    tmp_budget = 24 << 20                      # target per-step temp working set
    per_edge = (n_in_pad + n_out_pad) * (8 + cd_bytes)   # iota(i32) + bool + one-hot
    e_tile = max(128, min(4096, (tmp_budget // per_edge) // 128 * 128))
    e_tile = min(e_tile, _round_up(max(E, 1), 128))      # don't over-pad tiny graphs
    e_pad = _round_up(max(E, 1), e_tile)
    num_e_tiles = e_pad // e_tile
    stage1_vmem = int(max(32 << 20,
                          min(64 << 20,
                              3 * w_bytes + per_edge * e_tile + (2 << 20))))

    # ----- Stage 2 tiling: feature tile from the remaining budget; >=2 tiles on v7x. --
    f_pad = _round_up(max(F, 1), 128)
    per_col = (n_in_pad + n_out_pad) * (2 * 4 + cd_bytes)  # dbl-buffered f32 tile + cast
    tf = max(128, min(f_pad, (tmp_budget // per_col) // 128 * 128))
    if f_pad >= 256:
        tf = min(tf, max(128, (f_pad // 2) // 128 * 128))   # keep both v7x TCs busy
    f_pad = _round_up(f_pad, tf)
    num_f_tiles = f_pad // tf
    stage2_vmem = int(max(32 << 20,
                          min(64 << 20,
                              3 * w_bytes
                              + 3 * (n_in_pad + n_out_pad) * tf * 4
                              + (2 << 20))))

    # ----- Padded inputs.  Padded edges: src = dst = 0, attr = 0 -> contribute 0. -----
    src = jnp.zeros((1, e_pad), jnp.int32).at[0, :E].set(edge_index[0].astype(jnp.int32))
    dst = jnp.zeros((1, e_pad), jnp.int32).at[0, :E].set(edge_index[1].astype(jnp.int32))
    attr = jnp.zeros((1, e_pad), jnp.float32).at[0, :E].set(
        edge_attr.reshape(-1).astype(jnp.float32))   # edge_attr.view(-1, 1) equivalent
    x_p = jnp.zeros((n_in_pad, f_pad), jnp.float32).at[:n_in, :F].set(
        x.astype(jnp.float32))

    # ----- Stage 1: W = S · diag(attr) · G (edge-tiled accumulation). -----------------
    w = pl.pallas_call(
        functools.partial(_build_w_kernel, compute_dtype=compute_dtype),
        out_shape=jax.ShapeDtypeStruct((n_out_pad, n_in_pad), jnp.float32),
        grid_spec=pltpu.PrefetchScalarGridSpec(
            num_scalar_prefetch=0,
            grid=(num_e_tiles,),
            in_specs=[
                pl.BlockSpec((1, e_tile), lambda e: (0, e)),   # src
                pl.BlockSpec((1, e_tile), lambda e: (0, e)),   # dst
                pl.BlockSpec((1, e_tile), lambda e: (0, e)),   # attr
            ],
            out_specs=pl.BlockSpec((n_out_pad, n_in_pad), lambda e: (0, 0)),
        ),
        compiler_params=pltpu.CompilerParams(
            dimension_semantics=("arbitrary",),        # W is an accumulator over edges
            vmem_limit_bytes=stage1_vmem,
        ),
        cost_estimate=pl.CostEstimate(
            flops=2 * e_pad * n_out_pad * n_in_pad,
            transcendentals=0,
            bytes_accessed=3 * e_pad * 4 + w_bytes,
        ),
    )(src, dst, attr)

    # ----- Stage 2: out = W @ x, one MXU matmul per independent feature tile. ---------
    out_p = pl.pallas_call(
        functools.partial(_apply_w_kernel, compute_dtype=compute_dtype),
        out_shape=jax.ShapeDtypeStruct((n_out_pad, f_pad), jnp.float32),
        grid_spec=pltpu.PrefetchScalarGridSpec(
            num_scalar_prefetch=0,
            grid=(num_f_tiles,),
            in_specs=[
                pl.BlockSpec((n_out_pad, n_in_pad), lambda j: (0, 0)),  # W (invariant)
                pl.BlockSpec((n_in_pad, tf), lambda j: (0, j)),         # x feature tile
            ],
            out_specs=pl.BlockSpec((n_out_pad, tf), lambda j: (0, j)),
        ),
        compiler_params=pltpu.CompilerParams(
            dimension_semantics=("parallel",),         # F-tiles independent (megacore)
            vmem_limit_bytes=stage2_vmem,
        ),
        cost_estimate=pl.CostEstimate(
            flops=2 * n_out_pad * n_in_pad * f_pad,
            transcendentals=0,
            bytes_accessed=w_bytes + n_in_pad * f_pad * 4 + n_out_pad * f_pad * 4,
        ),
    )(w, x_p)

    return out_p[:n_out, :F]


def _reference(x, edge_index, edge_attr, graphUnpoolData):
    n_out = int(graphUnpoolData["outputSize"])
    src = edge_index[0]
    dst = edge_index[1]
    msgs = x[src] * edge_attr.reshape(-1, 1)
    return jnp.zeros((n_out, x.shape[1]), jnp.float32).at[dst].add(msgs)


if __name__ == "__main__":
    key = jax.random.PRNGKey(0)
    k1, k2, k3, k4 = jax.random.split(key, 4)

    input_size = 8      # coarse graph nodes (source of messages)
    output_size = 16    # fine graph nodes   (targets / unpooled)
    feat = 32
    num_edges = 24

    x = jax.random.normal(k1, (input_size, feat), dtype=jnp.float32)
    src = jax.random.randint(k2, (num_edges,), 0, input_size, dtype=jnp.int32)
    dst = jax.random.randint(k3, (num_edges,), 0, output_size, dtype=jnp.int32)
    edge_index = jnp.stack([src, dst], axis=0)                      # (2, E)
    edge_attr = jax.random.uniform(k4, (num_edges,), dtype=jnp.float32)

    graphUnpoolData = {"inputSize": input_size, "outputSize": output_size}

    ref = _reference(x, edge_index, edge_attr, graphUnpoolData)

    # Exact (f32) path.
    out = custom_unpooling(x, edge_index, edge_attr, graphUnpoolData)
    out = jax.block_until_ready(out)
    assert out.shape == (output_size, feat)
    assert jnp.allclose(out, ref, atol=1e-4, rtol=1e-4)

    # Fast MXU path (bf16 operands, f32 accumulation) — looser tolerance.
    out_bf16 = custom_unpooling(x, edge_index, edge_attr, graphUnpoolData,
                                compute_dtype=jnp.bfloat16)
    out_bf16 = jax.block_until_ready(out_bf16)
    assert jnp.allclose(out_bf16, ref, atol=5e-2, rtol=5e-2)

    print("KERNEL_OK")
</pallas_src>

<mosaic_0001>
module attributes {stable_mosaic.version = 11 : i64} {
  func.func @_build_w_kernel(%arg0: i32, %arg1: memref<1x128xi32, #tpu.memory_space<vmem>>, %arg2: memref<1x128xi32, #tpu.memory_space<vmem>>, %arg3: memref<1x128xf32, #tpu.memory_space<vmem>>, %arg4: memref<16x128xf32, #tpu.memory_space<vmem>>) attributes {dimension_semantics = [#tpu.dimension_semantics<arbitrary>], iteration_bounds = array<i64: 1>, scalar_prefetch = 0 : i64, scratch_operands = 0 : i64, tpu.core_type = #tpu.core_type<tc>, window_params = [{transform_indices = @transform_0, window_bounds = array<i64: 1, 128>}, {transform_indices = @transform_1, window_bounds = array<i64: 1, 128>}, {transform_indices = @transform_2, window_bounds = array<i64: 1, 128>}, {pipeline_mode = #tpu.pipeline_mode<synchronous>, transform_indices = @transform_3, window_bounds = array<i64: 16, 128>}]} {
    %c0_i32 = arith.constant 0 : i32
    %0 = arith.cmpi eq, %arg0, %c0_i32 : i32
    %1 = arith.extui %0 : i1 to i32
    %c0_i32_0 = arith.constant 0 : i32
    %2 = arith.cmpi ne, %1, %c0_i32_0 : i32
    scf.if %2 {
      %cst_11 = arith.constant 0.000000e+00 : f32
      %22 = vector.broadcast %cst_11 : f32 to vector<16x128xf32>
      %c0_12 = arith.constant 0 : index
      %c0_13 = arith.constant 0 : index
      %23 = vector.load %arg4[%c0_12, %c0_13] : memref<16x128xf32, #tpu.memory_space<vmem>>, vector<16x128xf32>
      tpu.vector_store %arg4[%c0_12, %c0_13], %22 {strides = array<i32>} : memref<16x128xf32, #tpu.memory_space<vmem>>, vector<16x128xf32>,
    } else {
    }
    %3 = tpu.iota {dimensions = array<i32: 0>} : vector<16x128xi32>
    %c0 = arith.constant 0 : index
    %c0_1 = arith.constant 0 : index
    %4 = vector.load %arg2[%c0, %c0_1] : memref<1x128xi32, #tpu.memory_space<vmem>>, vector<1x128xi32>
    %5 = vector.broadcast %4 : vector<1x128xi32> to vector<16x128xi32>
    %6 = arith.cmpi eq, %3, %5 : vector<16x128xi32>
    %7 = arith.extui %6 : vector<16x128xi1> to vector<16x128xi32>
    %8 = arith.sitofp %7 : vector<16x128xi32> to vector<16x128xf32>
    %9 = tpu.iota {dimensions = array<i32: 0>} : vector<128x128xi32>
    %c0_2 = arith.constant 0 : index
    %c0_3 = arith.constant 0 : index
    %10 = vector.load %arg1[%c0_2, %c0_3] : memref<1x128xi32, #tpu.memory_space<vmem>>, vector<1x128xi32>
    %11 = vector.broadcast %10 : vector<1x128xi32> to vector<128x128xi32>
    %12 = arith.cmpi eq, %9, %11 : vector<128x128xi32>
    %c0_4 = arith.constant 0 : index
    %c0_5 = arith.constant 0 : index
    %13 = vector.load %arg3[%c0_4, %c0_5] : memref<1x128xf32, #tpu.memory_space<vmem>>, vector<1x128xf32>
    %cst = arith.constant 0.000000e+00 : f32
    %14 = vector.shape_cast %13 : vector<1x128xf32> to vector<1x128xf32>
    %15 = vector.broadcast %14 : vector<1x128xf32> to vector<128x128xf32>
    %16 = vector.broadcast %cst : f32 to vector<128x128xf32>
    %17 = arith.select %12, %15, %16 : vector<128x128xi1>, vector<128x128xf32>
    %c0_6 = arith.constant 0 : index
    %c0_7 = arith.constant 0 : index
    %18 = vector.load %arg4[%c0_6, %c0_7] : memref<16x128xf32, #tpu.memory_space<vmem>>, vector<16x128xf32>
    %cst_8 = arith.constant dense<0.000000e+00> : vector<16x128xf32>
    %19 = tpu.matmul %8, %17, %cst_8 {dimension_numbers = #tpu.dot_dimension_numbers<[1], [1], [0], [0], [0, 0, 1, 0], [], []>} : vector<16x128xf32>, vector<128x128xf32>, vector<16x128xf32> -> vector<16x128xf32>
    %20 = arith.addf %18, %19 : vector<16x128xf32>
    %c0_9 = arith.constant 0 : index
    %c0_10 = arith.constant 0 : index
    %21 = vector.load %arg4[%c0_9, %c0_10] : memref<16x128xf32, #tpu.memory_space<vmem>>, vector<16x128xf32>
    tpu.vector_store %arg4[%c0_9, %c0_10], %20 {strides = array<i32>} : memref<16x128xf32, #tpu.memory_space<vmem>>, vector<16x128xf32>,
    return
  }
  func.func @transform_0(%arg0: i32) -> (i32, i32) {
    %c0_i32 = arith.constant 0 : i32
    %c0_i32_0 = arith.constant 0 : i32
    return %c0_i32, %arg0 : i32, i32
  }
  func.func @transform_1(%arg0: i32) -> (i32, i32) {
    %c0_i32 = arith.constant 0 : i32
    %c0_i32_0 = arith.constant 0 : i32
    return %c0_i32, %arg0 : i32, i32
  }
  func.func @transform_2(%arg0: i32) -> (i32, i32) {
    %c0_i32 = arith.constant 0 : i32
    %c0_i32_0 = arith.constant 0 : i32
    return %c0_i32, %arg0 : i32, i32
  }
  func.func @transform_3(%arg0: i32) -> (i32, i32) {
    %c0_i32 = arith.constant 0 : i32
    %c0_i32_0 = arith.constant 0 : i32
    %c0_i32_1 = arith.constant 0 : i32
    return %c0_i32, %c0_i32_0 : i32, i32
  }
}

</mosaic_0001>

<bundles_post_ra>
// kernel: tpu_custom_call.1
= control target key start
LH: loop header
LB: loop body
LE: loop exit
PB: predicated region body
PF: predicated region fallthrough
CT: control target
= control target key end

     0   :  { %8 = vsyncpa [#allocation3], 0  ;;  %s441_s0 = inlined_call_operand.hbm [shape: s32[1,128], index: 0, kind: input, shape index: {}]   ;;  %s442_s1 = inlined_call_operand.vmem [shape: s32[1,128], index: 1, kind: input, shape index: {}]   ;;  %s443_s2 = inlined_call_operand.vmem [shape: f32[1,128], index: 2, kind: input, shape index: {}]   ;;  %s444_s3 = inlined_call_operand.hbm [shape: f32[16,128], index: 3, kind: output, shape index: {}]  }
   0x1   :  { %9 = vsyncpa [#allocation4], 0  ;;  %s329_s12 = smov [#allocation2]  }
   0x2   :  { %s16_s13 = sshll.u32 %s329_s12, 4  ;;  %s17_s13 = int_to_ptr.vmem [resolvable:$true] %s16_s13 }
   0x3   :  { %s293_s14 = scalar_lea.vmem %s17_s13, 16  ;;  %s297_s15 = scalar_lea.vmem %s17_s13, 32 }
   0x4   :  { %p294_p0 = scmp.ne.s32.totalorder %s17_s13, %s293_s14  ;;  %p298_p1 = scmp.lt.s32.totalorder %s17_s13, %s17_s13 }
   0x5   :  { %p299_p2 = scmp.lt.s32.totalorder %s297_s15, %s293_s14 }
   0x7   :  { %p300_p3 = por %p299_p2, %p298_p1 }
   0x9   :  { %p301_p4 = pnand %p300_p3, %p294_p0 }
   0xb   :  { %304 = shalt.err (!%p301_p4)
}
   0xc   :  { %19 = dma.hbm_to_vmem [thread:$0]  %s441_s0, 16, %s17_s13, [#allocation3]  }
   0xd   :  { %325 = dma.done.wait [#allocation3], 16  }
   0xe   :  { %326 = vsyncadd [#allocation3], 4294967280  ;;  %v33_v0 = vlaneseq  ;;  %v364_v4 = vld [vmem:[%s443_s2] ss:$0 sm:$0xff]  ;;  %v330_v9 = vmov 1.0  }
   0xf   :  { %v366_v5 = vld [vmem:[#allocation2] ss:$0 sm:$0xff] }
  0x10   :  { %v357_v1 = vshrl.u32 %v33_v0, 7  ;;  %v375_v7 = vld [vmem:[%s442_s1] ss:$0 sm:$0xff]  ;;  %s331_s1 = smov [#allocation5]  }
  0x11   :  { %s191_s2 = sshll.u32 %s331_s1, 4  ;;  %s192_s2 = int_to_ptr.vmem [resolvable:$true] %s191_s2 }
  0x12   :  { %v60_v2 = vadd.s32 120, %v357_v1  ;;  %v59_v3 = vadd.s32 112, %v357_v1  ;;  %v58_v6 = vadd.s32 104, %v357_v1  ;;  %v57_v8 = vadd.s32 96, %v357_v1  ;;  %s305_s21 = scalar_lea.vmem %s192_s2, 256  ;;  %p310_p6 = scmp.lt.s32.totalorder %s192_s2, %s192_s2 }
  0x13   :  { %vm41_vm3 = vcmp.eq.s32.totalorder %v357_v1, %v375_v7  ;;  %v56_v10 = vadd.s32 88, %v357_v1  ;;  %v55_v11 = vadd.s32 80, %v357_v1  ;;  %v54_v12 = vadd.s32 72, %v357_v1  ;;  %p306_p5 = scmp.ne.s32.totalorder %s192_s2, %s305_s21  ;;  %p311_p7 = scmp.lt.s32.totalorder %s305_s21, %s305_s21 }
  0x14   :  { %vm81_vm0 = vcmp.eq.s32.totalorder %v60_v2, %v366_v5  ;;  %vm80_vm1 = vcmp.eq.s32.totalorder %v59_v3, %v366_v5  ;;  %vm79_vm2 = vcmp.eq.s32.totalorder %v58_v6, %v366_v5  ;;  %276 = vmatprep.mubr.msk.f32.mxu0 %vm41_vm3, %v330_v9  ;;  %vm78_vm4 = vcmp.eq.s32.totalorder %v57_v8, %v366_v5 }
  0x15   :  { %244 = vmatprep.subr.msk.mxu0 %vm81_vm0, %v364_v4  ;;  %vm77_vm5 = vcmp.eq.s32.totalorder %v56_v10, %v366_v5  ;;  %vm76_vm6 = vcmp.eq.s32.totalorder %v55_v11, %v366_v5  ;;  %vm75_vm7 = vcmp.eq.s32.totalorder %v54_v12, %v366_v5  ;;  %v53_v13 = vadd.s32 64, %v357_v1  ;;  %p312_p8 = por %p311_p7, %p310_p6 }
  0x16   :  { %245 = vmatpush3.xpose.msk.msra.mxu0 %vm81_vm0, %v364_v4  ;;  %v52_v14 = vadd.s32 56, %v357_v1  ;;  %v51_v15 = vadd.s32 48, %v357_v1  ;;  %v50_v16 = vadd.s32 40, %v357_v1  ;;  %v49_v17 = vadd.s32 32, %v357_v1 }
  0x17   :  { %246 = vmatprep.subr.msk.mxu0 %vm80_vm1, %v364_v4  ;;  %vm74_vm8 = vcmp.eq.s32.totalorder %v53_v13, %v366_v5  ;;  %v48_v18 = vadd.s32 24, %v357_v1  ;;  %v47_v19 = vadd.s32 16, %v357_v1  ;;  %v35_v20 = vadd.s32 8, %v357_v1  ;;  %p313_p9 = pnand %p312_p8, %p306_p5 }
  0x18   :  { %vm73_vm9 = vcmp.eq.s32.totalorder %v52_v14, %v366_v5  ;;  %vm72_vm10 = vcmp.eq.s32.totalorder %v51_v15, %v366_v5  ;;  %vm71_vm11 = vcmp.eq.s32.totalorder %v50_v16, %v366_v5  ;;  %vm70_vm12 = vcmp.eq.s32.totalorder %v49_v17, %v366_v5 }
  0x19   :  { %vm69_vm13 = vcmp.eq.s32.totalorder %v48_v18, %v366_v5  ;;  %vm68_vm14 = vcmp.eq.s32.totalorder %v47_v19, %v366_v5  ;;  %vm67_vm15 = vcmp.eq.s32.totalorder %v35_v20, %v366_v5  ;;  %vm66_vm0 = vcmp.eq.s32.totalorder %v357_v1, %v366_v5 }
  0x1a   :  { %247 = vmatpush3.xpose.msk.msra.mxu0 %vm80_vm1, %v364_v4  ;;  %vm42_vm1 = vcmp.eq.s32.totalorder %v35_v20, %v375_v7 }
  0x1b   :  { %248 = vmatprep.subr.msk.mxu0 %vm79_vm2, %v364_v4 }
  0x1e   :  { %249 = vmatpush3.xpose.msk.msra.mxu0 %vm79_vm2, %v364_v4 }
  0x1f   :  { %250 = vmatprep.subr.msk.mxu0 %vm78_vm4, %v364_v4 }
  0x22   :  { %251 = vmatpush3.xpose.msk.msra.mxu0 %vm78_vm4, %v364_v4 }
  0x23   :  { %252 = vmatprep.subr.msk.mxu0 %vm77_vm5, %v364_v4 }
  0x26   :  { %253 = vmatpush3.xpose.msk.msra.mxu0 %vm77_vm5, %v364_v4 }
  0x27   :  { %254 = vmatprep.subr.msk.mxu0 %vm76_vm6, %v364_v4 }
  0x2a   :  { %255 = vmatpush3.xpose.msk.msra.mxu0 %vm76_vm6, %v364_v4 }
  0x2b   :  { %256 = vmatprep.subr.msk.mxu0 %vm75_vm7, %v364_v4 }
  0x2e   :  { %257 = vmatpush3.xpose.msk.msra.mxu0 %vm75_vm7, %v364_v4 }
  0x2f   :  { %258 = vmatprep.subr.msk.mxu0 %vm74_vm8, %v364_v4 }
  0x32   :  { %259 = vmatpush3.xpose.msk.msra.mxu0 %vm74_vm8, %v364_v4 }
  0x33   :  { %260 = vmatprep.subr.msk.mxu0 %vm73_vm9, %v364_v4 }
  0x36   :  { %261 = vmatpush3.xpose.msk.msra.mxu0 %vm73_vm9, %v364_v4 }
  0x37   :  { %262 = vmatprep.subr.msk.mxu0 %vm72_vm10, %v364_v4 }
  0x3a   :  { %263 = vmatpush3.xpose.msk.msra.mxu0 %vm72_vm10, %v364_v4 }
  0x3b   :  { %264 = vmatprep.subr.msk.mxu0 %vm71_vm11, %v364_v4 }
  0x3e   :  { %265 = vmatpush3.xpose.msk.msra.mxu0 %vm71_vm11, %v364_v4 }
  0x3f   :  { %266 = vmatprep.subr.msk.mxu0 %vm70_vm12, %v364_v4 }
  0x42   :  { %267 = vmatpush3.xpose.msk.msra.mxu0 %vm70_vm12, %v364_v4 }
  0x43   :  { %268 = vmatprep.subr.msk.mxu0 %vm69_vm13, %v364_v4 }
  0x46   :  { %269 = vmatpush3.xpose.msk.msra.mxu0 %vm69_vm13, %v364_v4 }
  0x47   :  { %270 = vmatprep.subr.msk.mxu0 %vm68_vm14, %v364_v4 }
  0x4a   :  { %271 = vmatpush3.xpose.msk.msra.mxu0 %vm68_vm14, %v364_v4 }
  0x4b   :  { %272 = vmatprep.subr.msk.mxu0 %vm67_vm15, %v364_v4 }
  0x4e   :  { %273 = vmatpush3.xpose.msk.msra.mxu0 %vm67_vm15, %v364_v4 }
  0x4f   :  { %274 = vmatprep.subr.msk.mxu0 %vm66_vm0, %v364_v4 }
  0x52   :  { %275 = vmatpush3.xpose.msk.msra.mxu0 %vm66_vm0, %v364_v4 }
  0x55   :  { %277 = vmatmul.mubr.msk.f32.vlgmr.msra.gmra.mxu0 %vm42_vm1, %v330_v9 }
 0x115   :  { %v278_v21 = vpop.f32.mrf.mxu0 }
 0x116   :  { %185 = vst [vmem:[#allocation5 + $0x8] sm:$0xff] %v278_v21 }
 0x117   :  { %v173_v22 = vpop.f32.mrf.mxu0 }
 0x118   :  { %184 = vst [vmem:[#allocation5] sm:$0xff] %v173_v22 }
 0x119   :  { %316 = shalt.err (!%p313_p9)
}
 0x11a   :  { %s332_s22 = smov 128   ;;  %s333_s23 = smov 8  }
 0x11b   :  { %197 = dma.vmem_to_hbm [thread:$0]  %s192_s2, 256, %s444_s3, [#allocation4], %s332_s22, %s332_s22, %s333_s23  }
 0x11c   :  { %327 = dma.done.wait [#allocation4], 256  }
 0x11d   :  { %328 = vsyncadd [#allocation4], 4294967040 }
 0x11e   :  { %201 = vsyncpa [#allocation3], 1 }
 0x11f   :  { %202 = vsyncpa [#allocation4], 1 }

</bundles_post_ra>
